<compile_context>
chip_gen: v7x
topology: tpu7x:2x2x1
jax: 0.10.0
libtpu: 0.0.40
codegen_flags: <defaults>
</compile_context>

<pallas_src>
import jax
import jax.numpy as jnp
from jax.experimental import pallas as pl
from jax.experimental.pallas import tpu as pltpu

OUT_SIZES = (19, 18, 6, 2, 1, 4)        # per-layer output widths from __init__
TOTAL_OUT = sum(OUT_SIZES)              # 50
N_PAD = 128                             # lane-dense padded output width
VMEM_BUDGET = 40 << 20                  # live-buffer budget; safe on v7x (64 MiB)
MAX_TB = 8192                           # batch-tile cap (review: 4096-8192 rows)
ITEM = 4                                # f32 bytes


def _round_up(x, m):
    return ((x + m - 1) // m) * m


def fc_capsuled_kernel(x_ref, w_ref, b_ref, o_ref):
    # x_ref: (TB, F)  w_ref: (F, 128)  b_ref: (1, 128)  o_ref: (TB, 128)
    acc = jnp.dot(x_ref[...], w_ref[...], preferred_element_type=jnp.float32)
    o_ref[...] = (acc + b_ref[...]).astype(o_ref.dtype)


def prepare_params(weights, biases):
    """One-time parameter prep: fuse the six Linear layers into a single
    lane-padded (F, 128) weight and (1, 128) bias.  Do NOT call per-forward."""
    F = weights[0].shape[1]
    w_cat = jnp.concatenate([w.T for w in weights], axis=1)           # (F, 50)
    b_cat = jnp.concatenate(biases, axis=0).reshape(1, TOTAL_OUT)     # (1, 50)
    w_pad = jnp.zeros((F, N_PAD), w_cat.dtype).at[:, :TOTAL_OUT].set(w_cat)
    b_pad = jnp.zeros((1, N_PAD), b_cat.dtype).at[:, :TOTAL_OUT].set(b_cat)
    return w_pad, b_pad


def _pick_tile(B, F):
    """VMEM-aware batch tile.

    Bytes per pipelined row ~ 2*TB*F_pad*4 (x, double-buffered)
                            + 2*TB*128*4  (out, double-buffered);
    resident: fused weight (F_pad x 128) + bias, double-buffered.
    Caps: MAX_TB rows; ~ceil(B/2) (rounded to 8) when B >= 16 so the parallel
    batch axis has >= 2 grid steps (both v7x TensorCores get work); TB <= B.
    """
    if B <= 8:
        return B                                  # single full-extent block
    F_pad = _round_up(max(F, 1), 128)
    per_row = 2 * (F_pad + N_PAD) * ITEM
    resident = 2 * (F_pad + 8) * N_PAD * ITEM
    avail = max(VMEM_BUDGET - resident, per_row * 8)
    tb = min(MAX_TB, avail // per_row)
    if B >= 16:
        tb = min(tb, _round_up((B + 1) // 2, 8))  # guarantee >= 2 grid steps
    tb = min(tb, (B // 8) * 8)                    # TB <= B, multiple of 8
    return max(8, (tb // 8) * 8)


def fully_connected_capsuled(x, w_pad, b_pad, return_padded=False):
    """x: (B, F) float32. w_pad: (F, 128). b_pad: (1, 128).

    Returns (B, 50) to match the PyTorch forward, or the raw lane-dense
    (B, 128) buffer if return_padded=True (lets a fused consumer do the slice
    and avoids an extra HBM read/write pass on this memory-bound op)."""
    B, F = x.shape
    TB = _pick_tile(B, F)
    grid = (pl.cdiv(B, TB),)                      # trailing partial block is masked

    F_pad = _round_up(max(F, 1), 128)
    TB_pad = _round_up(TB, 8)
    B_pad = _round_up(B, 8)

    # Explicit scoped-VMEM limit from the actual buffer bytes (+~30% headroom),
    # clamped for v7x's 64 MiB physical VMEM.
    buf_bytes = (2 * TB_pad * F_pad + 2 * TB_pad * N_PAD
                 + 2 * F_pad * N_PAD + 2 * 8 * N_PAD) * ITEM
    vmem_limit = max(4 << 20, min(int(buf_bytes * 1.3) + (1 << 20), 64 << 20))

    # Padded HBM footprints (lane dim rounded to 128, sublane to 8).
    bytes_io = ITEM * (B_pad * F_pad          # x
                       + F_pad * N_PAD        # fused weight
                       + 8 * N_PAD            # fused bias
                       + B_pad * N_PAD)       # output

    out_padded = pl.pallas_call(
        fc_capsuled_kernel,
        out_shape=jax.ShapeDtypeStruct((B, N_PAD), x.dtype),
        grid_spec=pltpu.PrefetchScalarGridSpec(
            num_scalar_prefetch=0,
            grid=grid,
            in_specs=[
                pl.BlockSpec((TB, F), lambda i: (i, 0)),       # x tile
                pl.BlockSpec((F, N_PAD), lambda i: (0, 0)),    # fused weight (resident)
                pl.BlockSpec((1, N_PAD), lambda i: (0, 0)),    # fused bias (resident)
            ],
            out_specs=pl.BlockSpec((TB, N_PAD), lambda i: (i, 0)),
        ),
        compiler_params=pltpu.CompilerParams(
            dimension_semantics=("parallel",),
            vmem_limit_bytes=vmem_limit,
        ),
        cost_estimate=pl.CostEstimate(
            flops=2 * B * F * TOTAL_OUT,
            transcendentals=0,
            bytes_accessed=bytes_io,
        ),
    )(x, w_pad, b_pad)

    if return_padded:
        return out_padded
    # Slice the lane padding back off to match the PyTorch (B, 50) output.
    return out_padded[:, :TOTAL_OUT]


def init_params(key, num_of_features):
    """Deterministic init matching PyTorch Linear default: U(-1/sqrt(F), 1/sqrt(F))."""
    bound = 1.0 / (num_of_features ** 0.5)
    weights, biases = [], []
    for out_f in OUT_SIZES:
        key, kw, kb = jax.random.split(key, 3)
        weights.append(jax.random.uniform(
            kw, (out_f, num_of_features), jnp.float32, -bound, bound))
        biases.append(jax.random.uniform(
            kb, (out_f,), jnp.float32, -bound, bound))
    return weights, biases


if __name__ == "__main__":
    key = jax.random.PRNGKey(0)
    F = 32  # num_of_features

    key, kp = jax.random.split(key)
    weights, biases = init_params(kp, F)

    # One-time parameter preparation (hoisted out of the forward path).
    w_pad, b_pad = prepare_params(weights, biases)
    w_pad, b_pad = jax.block_until_ready((w_pad, b_pad))

    fwd = jax.jit(fully_connected_capsuled, static_argnames=("return_padded",))

    ok = True
    # Small batch (single full-extent block) and a ragged batch (cdiv grid with
    # a masked partial trailing block).
    for B in (2, 100):
        key, kx = jax.random.split(key)
        x = jax.random.normal(kx, (B, F), jnp.float32)

        out = fwd(x, w_pad, b_pad)
        out = jax.block_until_ready(out)

        # Reference check in plain JAX (same math as the PyTorch forward + cat).
        ref = jnp.concatenate([x @ w.T + b for w, b in zip(weights, biases)], axis=1)
        ok = ok and out.shape == (B, TOTAL_OUT)
        ok = ok and bool(jnp.allclose(out, ref, atol=1e-5, rtol=1e-5))

    assert ok
    print("KERNEL_OK")
</pallas_src>

<mosaic_0001>
module attributes {stable_mosaic.version = 11 : i64} {
  func.func @fc_capsuled_kernel(%arg0: i32, %arg1: memref<2x32xf32, #tpu.memory_space<vmem>>, %arg2: memref<32x128xf32, #tpu.memory_space<vmem>>, %arg3: memref<1x128xf32, #tpu.memory_space<vmem>>, %arg4: memref<2x128xf32, #tpu.memory_space<vmem>>) attributes {dimension_semantics = [#tpu.dimension_semantics<parallel>], iteration_bounds = array<i64: 1>, scalar_prefetch = 0 : i64, scratch_operands = 0 : i64, tpu.core_type = #tpu.core_type<tc>, window_params = [{transform_indices = @transform_0, window_bounds = array<i64: 2, 32>}, {pipeline_mode = #tpu.pipeline_mode<synchronous>, transform_indices = @transform_1, window_bounds = array<i64: 32, 128>}, {pipeline_mode = #tpu.pipeline_mode<synchronous>, transform_indices = @transform_2, window_bounds = array<i64: 1, 128>}, {transform_indices = @transform_3, window_bounds = array<i64: 2, 128>}]} {
    %c0 = arith.constant 0 : index
    %c0_0 = arith.constant 0 : index
    %0 = vector.load %arg1[%c0, %c0_0] : memref<2x32xf32, #tpu.memory_space<vmem>>, vector<2x32xf32>
    %c0_1 = arith.constant 0 : index
    %c0_2 = arith.constant 0 : index
    %1 = vector.load %arg2[%c0_1, %c0_2] : memref<32x128xf32, #tpu.memory_space<vmem>>, vector<32x128xf32>
    %cst = arith.constant dense<0.000000e+00> : vector<2x128xf32>
    %2 = tpu.matmul %0, %1, %cst {dimension_numbers = #tpu.dot_dimension_numbers<[1], [0], [0], [1], [0, 0, 1, 1], [], []>} : vector<2x32xf32>, vector<32x128xf32>, vector<2x128xf32> -> vector<2x128xf32>
    %c0_3 = arith.constant 0 : index
    %c0_4 = arith.constant 0 : index
    %3 = vector.load %arg3[%c0_3, %c0_4] : memref<1x128xf32, #tpu.memory_space<vmem>>, vector<1x128xf32>
    %4 = vector.broadcast %3 : vector<1x128xf32> to vector<2x128xf32>
    %5 = arith.addf %2, %4 : vector<2x128xf32>
    %c0_5 = arith.constant 0 : index
    %c0_6 = arith.constant 0 : index
    %6 = vector.load %arg4[%c0_5, %c0_6] : memref<2x128xf32, #tpu.memory_space<vmem>>, vector<2x128xf32>
    tpu.vector_store %arg4[%c0_5, %c0_6], %5 {strides = array<i32>} : memref<2x128xf32, #tpu.memory_space<vmem>>, vector<2x128xf32>,
    return
  }
  func.func @transform_0(%arg0: i32) -> (i32, i32) {
    %c0_i32 = arith.constant 0 : i32
    %c0_i32_0 = arith.constant 0 : i32
    return %arg0, %c0_i32 : i32, i32
  }
  func.func @transform_1(%arg0: i32) -> (i32, i32) {
    %c0_i32 = arith.constant 0 : i32
    %c0_i32_0 = arith.constant 0 : i32
    %c0_i32_1 = arith.constant 0 : i32
    return %c0_i32, %c0_i32_0 : i32, i32
  }
  func.func @transform_2(%arg0: i32) -> (i32, i32) {
    %c0_i32 = arith.constant 0 : i32
    %c0_i32_0 = arith.constant 0 : i32
    %c0_i32_1 = arith.constant 0 : i32
    return %c0_i32, %c0_i32_0 : i32, i32
  }
  func.func @transform_3(%arg0: i32) -> (i32, i32) {
    %c0_i32 = arith.constant 0 : i32
    %c0_i32_0 = arith.constant 0 : i32
    return %arg0, %c0_i32 : i32, i32
  }
}

</mosaic_0001>

<bundles_post_ra>
// kernel: fully_connected_capsuled.1
= control target key start
LH: loop header
LB: loop body
LE: loop exit
PB: predicated region body
PF: predicated region fallthrough
CT: control target
= control target key end

     0   :  { %8 = vsyncpa [#allocation3], 0  ;;  %s322_s0 = inlined_call_operand.hbm [shape: f32[2,32], index: 0, kind: input, shape index: {}]   ;;  %s323_s1 = inlined_call_operand.hbm [shape: f32[32,128], index: 1, kind: input, shape index: {}]   ;;  %s324_s2 = inlined_call_operand.vmem [shape: f32[1,128], index: 2, kind: input, shape index: {}]   ;;  %s325_s3 = inlined_call_operand.hbm [shape: f32[2,128], index: 3, kind: output, shape index: {}]  }
   0x1   :  { %9 = vsyncpa [#allocation6], 0 }
   0x2   :  { %10 = vsyncpa [#allocation4], 0  ;;  %s248_s12 = smov [#allocation2]   ;;  %s249_s14 = smov [#allocation5]  }
   0x3   :  { %s17_s13 = sshll.u32 %s248_s12, 4  ;;  %s26_s15 = sshll.u32 %s249_s14, 4  ;;  %s18_s13 = int_to_ptr.vmem [resolvable:$true] %s17_s13  ;;  %s276_s15 = int_to_ptr.vmem [resolvable:$true] %s26_s15 }
   0x4   :  { %s176_s18 = scalar_lea.hbm %s322_s0, 32 }
   0x5   :  { %p177_p0 = scmp.ne.s32.totalorder %s322_s0, %s176_s18  ;;  %p180_p1 = scmp.lt.u32.totalorder %s176_s18, %s322_s0 }
   0x7   :  { %p182_p2 = pnand %p180_p1, %p177_p0 }
   0x9   :  { %185 = shalt.err (!%p182_p2)
}
   0xa   :  { %s186_s23 = scalar_lea.vmem %s18_s13, 32  ;;  %p191_p4 = scmp.lt.s32.totalorder %s18_s13, %s18_s13 }
   0xb   :  { %p187_p3 = scmp.ne.s32.totalorder %s18_s13, %s186_s23  ;;  %p192_p5 = scmp.lt.s32.totalorder %s186_s23, %s186_s23 }
   0xd   :  { %p193_p6 = por %p192_p5, %p191_p4 }
   0xf   :  { %p194_p7 = pnand %p193_p6, %p187_p3 }
  0x11   :  { %197 = shalt.err (!%p194_p7)
}
  0x12   :  { %20 = dma.hbm_to_vmem [thread:$0]  %s322_s0, 32, %s18_s13, [#allocation3]  }
  0x13   :  { %s198_s28 = scalar_lea.hbm %s323_s1, 512 }
  0x14   :  { %p199_p8 = scmp.ne.s32.totalorder %s323_s1, %s198_s28  ;;  %p202_p9 = scmp.lt.u32.totalorder %s198_s28, %s323_s1 }
  0x16   :  { %p204_p10 = pnand %p202_p9, %p199_p8 }
  0x18   :  { %207 = shalt.err (!%p204_p10)
}
  0x19   :  { %s208_s6 = scalar_lea.vmem %s276_s15, 512  ;;  %p213_p12 = scmp.lt.s32.totalorder %s276_s15, %s276_s15 }
  0x1a   :  { %p209_p11 = scmp.ne.s32.totalorder %s276_s15, %s208_s6  ;;  %p214_p13 = scmp.lt.s32.totalorder %s208_s6, %s208_s6 }
  0x1c   :  { %p215_p0 = por %p214_p13, %p213_p12 }
  0x1e   :  { %p216_p1 = pnand %p215_p0, %p209_p11 }
  0x20   :  { %219 = shalt.err (!%p216_p1)
}
  0x21   :  { %s250_s0 = smov 128   ;;  %s251_s7 = smov 8  }
  0x22   :  { %32 = dma.hbm_to_vmem [thread:$0]  %s323_s1, 512, %s276_s15, [#allocation6], %s250_s0, %s250_s0, %s251_s7  }
  0x23   :  { %242 = dma.done.wait [#allocation3], 32  }
  0x24   :  { %243 = vsyncadd [#allocation3], 4294967264 }
  0x25   :  { %244 = dma.done.wait [#allocation6], 512  }
  0x26   :  { %245 = vsyncadd [#allocation6], 4294966784  ;;  %v252_v0 = vmov 0.0|0.0   ;;  %vm253_vm0 = vmmov 0   ;;  %v254_v1 = vmov 0.0   ;;  %v42_v2 = vld [vmem:[#allocation5] sm:$0xff] }
  0x27   :  { %162 = vmatprep.subr.bf16.mxu0 %v252_v0  ;;  %159 = vmatprep.mubr.msk.f32.mxu0 %vm253_vm0, %v254_v1  ;;  %v43_v3 = vld [vmem:[#allocation5 + $0x8] sm:$0xff]  ;;  %v44_v4 = vld [vmem:[#allocation5 + $0x10] sm:$0xff]  ;;  %v45_v6 = vld [vmem:[#allocation5 + $0x18] sm:$0xff]  ;;  %vm53_vm1 = vcmask 261120   ;;  %s255_s11 = smov [#allocation7]  }
  0x28   :  { %v163_v5 = vpack.c.bf16 %v43_v3, %v42_v2  ;;  %v166_v7 = vpack.c.bf16 %v45_v6, %v44_v4  ;;  %v41_v8 = vld [vmem:[#allocation2] sm:$0x3]  ;;  %s134_s12 = sshll.u32 %s255_s11, 4  ;;  %s135_s12 = int_to_ptr.vmem [resolvable:$true] %s134_s12 }
  0x29   :  { %v144_v9 = vld [vmem:[%s324_s2] ss:$0 sm:$0xff]  ;;  %s220_s13 = scalar_lea.vmem %s135_s12, 32  ;;  %p225_p3 = scmp.lt.s32.totalorder %s135_s12, %s135_s12 }
  0x2a   :  { %164 = vmatpush3.bf16.msra.mxu0 %v163_v5  ;;  %p221_p2 = scmp.ne.s32.totalorder %s135_s12, %s220_s13  ;;  %p226_p4 = scmp.lt.s32.totalorder %s220_s13, %s220_s13 }
  0x2b   :  { %165 = vmatprep.subr.bf16.mxu0 %v252_v0 }
  0x2c   :  { %p227_p5 = por %p226_p4, %p225_p3 }
  0x2e   :  { %167 = vmatpush3.bf16.msra.mxu0 %v166_v7  ;;  %p228_p6 = pnand %p227_p5, %p221_p2 }
  0x31   :  { %160 = vmatmul.mubr.msk.f32.vlgmr.msra.gmra.mrb[0].mxu0 %vm53_vm1, %v41_v8 }
 0x104   :  { %v123_v10 = vpop.f32.mrb[0].mxu0 }
 0x105   :  { %v124_v11 = vadd.f32 %v144_v9, %v123_v10  ;;  %v161_v12 = vpop.f32.mrb[1].mxu0 }
 0x107   :  { %127 = vst [vmem:[#allocation7] sm:$0x3] %v124_v11 }
 0x108   :  { %231 = shalt.err (!%p228_p6)
}
 0x109   :  { %s232_s16 = scalar_lea.hbm %s325_s3, 32 }
 0x10a   :  { %p233_p7 = scmp.ne.s32.totalorder %s325_s3, %s232_s16  ;;  %p236_p8 = scmp.lt.u32.totalorder %s232_s16, %s325_s3 }
 0x10c   :  { %p238_p9 = pnand %p236_p8, %p233_p7 }
 0x10e   :  { %241 = shalt.err (!%p238_p9)
}
 0x10f   :  { %137 = dma.vmem_to_hbm [thread:$0]  %s135_s12, 32, %s325_s3, [#allocation4]  }
 0x110   :  { %246 = dma.done.wait [#allocation4], 32  }
 0x111   :  { %247 = vsyncadd [#allocation4], 4294967264 }
 0x112   :  { %141 = vsyncpa [#allocation3], 1 }
 0x113   :  { %142 = vsyncpa [#allocation6], 1 }
 0x114   :  { %143 = vsyncpa [#allocation4], 1 }

</bundles_post_ra>
